<compile_context>
chip_gen: v7x
topology: tpu7x:2x2x1
jax: 0.10.0
libtpu: 0.0.40
codegen_flags: <defaults>
</compile_context>

<pallas_src>
import functools

import jax
import jax.numpy as jnp
from jax import lax
from jax.experimental import pallas as pl
from jax.experimental.pallas import tpu as pltpu


# --------------------------------------------------------------------------- #
# Kernel bodies
# --------------------------------------------------------------------------- #
def _accumulate_taps(xflat, w_ref, b_ref, TH, W):
    """Shared 3x3-conv compute on a padded, flattened, lane-dense tile.

    xflat : (Cin, (TH+2)*W + 2)  guard col, top row, TH center rows, bottom
                                 row, guard col -- already in compute dtype.
    w_ref : (9, Cout, Cin)       gain-folded weights, tap-major (kh*3 + kw).
    b_ref : (Cout, 1)            gain-folded bias (f32).
    returns (Cout, TH*W) f32.
    """
    n = TH * W
    ow = lax.broadcasted_iota(jnp.int32, (1, n), 1) % W   # output column index
    left = ow == 0
    right = ow == W - 1
    one = jnp.ones((), xflat.dtype)
    w = w_ref[...]                                         # (9, Cout, Cin)

    acc = None
    for kh in range(3):
        for kw in range(3):
            off = kh * W + kw                              # guard offset folded in
            v = xflat[:, off:off + n]                      # (Cin, TH*W)
            if kw == 0:
                v = jnp.where(left, one, v)                # left constant-1 pad
            elif kw == 2:
                v = jnp.where(right, one, v)               # right constant-1 pad
            p = jnp.dot(w[kh * 3 + kw], v, preferred_element_type=jnp.float32)
            acc = p if acc is None else acc + p
    return acc + b_ref[...]                                # (Cout,1) broadcast


def _zero_conv_kernel_nohalo(xc_ref, w_ref, b_ref, o_ref, *, H, W):
    """Whole image in one row tile: both vertical borders are the 1-pad."""
    Cin = xc_ref.shape[1]
    pad = jnp.ones((Cin, W + 1), jnp.float32)              # guard col + pad row
    xflat = jnp.concatenate([pad, xc_ref[0], pad], axis=1)
    acc = _accumulate_taps(xflat.astype(w_ref.dtype), w_ref, b_ref, H, W)
    o_ref[0] = acc.astype(o_ref.dtype)


def _zero_conv_kernel_halo(xc_ref, xa_ref, xb_ref, w_ref, b_ref, o_ref, *, TH, W):
    """Row-tiled path: halo rows come from two 8-row views of the 4-D input."""
    Cin = xc_ref.shape[1]
    t = pl.program_id(1)
    nt = pl.num_programs(1)

    ra = xa_ref[...][0, :, 7, :]                           # row t*TH-1 (junk at t==0)
    rb = xb_ref[...][0, :, 0, :]                           # row (t+1)*TH (junk at last t)
    ones_row = jnp.ones((Cin, W), jnp.float32)
    ra = jnp.where(t == 0, ones_row, ra)                   # top image border -> 1
    rb = jnp.where(t == nt - 1, ones_row, rb)              # bottom image border -> 1

    guard = jnp.ones((Cin, 1), jnp.float32)
    xflat = jnp.concatenate([guard, ra, xc_ref[0], rb, guard], axis=1)
    acc = _accumulate_taps(xflat.astype(w_ref.dtype), w_ref, b_ref, TH, W)
    o_ref[0] = acc.astype(o_ref.dtype)


# --------------------------------------------------------------------------- #
# Host-side helpers
# --------------------------------------------------------------------------- #
def _vmem_config():
    """(tile budget bytes, vmem_limit_bytes) for the local TPU generation."""
    try:
        cap = int(pltpu.get_tpu_info().vmem_capacity_bytes)
    except Exception:
        cap = 64 << 20                         # conservative (v7x per-TC) fallback
    if cap >= (100 << 20):                     # v5e / v6e: 128 MiB per TensorCore
        return 72 << 20, 96 << 20
    return 40 << 20, 56 << 20                  # v7x: 64 MiB per TensorCore


def _pick_tile_rows(B, H, W, Cin, Cout, budget_bytes):
    """Largest row tile (multiple of 8, dividing H, lane-dense) within budget."""
    # f32 working set per output row: double-buffered center input (2*Cin),
    # xflat (Cin), ~2 live tap temporaries (2*Cin), acc (Cout),
    # double-buffered output (2*Cout).
    per_row = 4 * W * (5 * Cin + 3 * Cout)
    # Fixed: two double-buffered 8-row halo blocks, weights, pad temps, slack.
    fixed = 4 * (4 * 8 * Cin * W + 2 * 9 * Cout * Cin + 4 * Cin * W) + (1 << 20)
    th_max = max(8, (budget_bytes - fixed) // per_row)
    cands = [d for d in range(8, H + 1, 8)
             if H % d == 0 and d <= th_max and (d == H or (d * W) % 128 == 0)]
    if not cands:
        # Fall back to the smallest legal tile (may exceed the soft budget).
        return 8 if (8 * W) % 128 == 0 else H
    if B == 1:
        # With B == 1 only a second row tile can feed v7x's second TensorCore.
        sub = [d for d in cands if d < H]
        if sub:
            return max(sub)
    return max(cands)


def _single_buffered_spec(block_shape, index_map):
    """Grid-invariant operand: single-buffer it if this JAX supports Buffered."""
    try:
        return pl.BlockSpec(block_shape, index_map, pipeline_mode=pl.Buffered(1))
    except Exception:
        return pl.BlockSpec(block_shape, index_map)


# --------------------------------------------------------------------------- #
# Public wrapper
# --------------------------------------------------------------------------- #
def zero_conv2d(x, weight, bias, scale, *, max_tile_rows=None):
    """ZeroConv2d forward.

    x      : (B, Cin, H, W) float32
    weight : (Cout, Cin, 3, 3) float32   (PyTorch conv weight layout)
    bias   : (Cout,) float32
    scale  : broadcastable to (Cout,) float32 (module's (1, Cout, 1, 1) param)
    returns: (B, Cout, H, W) float32
    """
    B, Cin, H, W = x.shape
    Cout = weight.shape[0]
    assert H % 8 == 0, "kernel assumes H % 8 == 0"

    budget, vmem_limit = _vmem_config()
    TH = _pick_tile_rows(B, H, W, Cin, Cout, budget)
    if max_tile_rows is not None:
        TH = max(8, min(TH, max_tile_rows))
    NT = H // TH
    NB8 = TH // 8                                  # 8-row blocks per tile

    # Hoist exp(scale*3) and fold into weight/bias: (conv+b)*g == conv(w*g)+b*g.
    gain = jnp.exp(scale.reshape(Cout).astype(jnp.float32) * 3.0)
    use_bf16 = (Cin >= 128 and Cout >= 128)        # only when MXU-bound
    compute_dtype = jnp.bfloat16 if use_bf16 else jnp.float32
    # (Cout,Cin,3,3) -> (3,3,Cout,Cin) -> (9,Cout,Cin), tap-major (kh*3+kw).
    w2g = (jnp.transpose(weight, (2, 3, 0, 1)).reshape(9, Cout, Cin)
           * gain[None, :, None]).astype(compute_dtype)
    bg = (bias.astype(jnp.float32) * gain).reshape(Cout, 1)

    x_flat = x.reshape(B, Cin, H * W)              # contiguous reshape: no copy
    L = H * W

    cost = pl.CostEstimate(
        flops=2 * B * H * W * Cout * 9 * Cin,
        transcendentals=0,
        bytes_accessed=int(4 * B * (Cin + Cout) * H * W
                           + w2g.size * jnp.dtype(w2g.dtype).itemsize
                           + 4 * Cout))
    cparams = pltpu.CompilerParams(
        dimension_semantics=("parallel",) if NT == 1 else ("parallel", "parallel"),
        vmem_limit_bytes=int(vmem_limit))

    if NT == 1:
        kernel = functools.partial(_zero_conv_kernel_nohalo, H=H, W=W)
        grid_spec = pltpu.PrefetchScalarGridSpec(
            num_scalar_prefetch=0, grid=(B,),
            in_specs=[pl.BlockSpec((1, Cin, L), lambda b: (b, 0, 0)),
                      _single_buffered_spec((9, Cout, Cin), lambda b: (0, 0, 0)),
                      _single_buffered_spec((Cout, 1), lambda b: (0, 0))],
            out_specs=pl.BlockSpec((1, Cout, L), lambda b: (b, 0, 0)))
        out_flat = pl.pallas_call(
            kernel,
            out_shape=jax.ShapeDtypeStruct((B, Cout, L), jnp.float32),
            grid_spec=grid_spec,
            compiler_params=cparams,
            cost_estimate=cost,
        )(x_flat, w2g, bg)
    else:
        kernel = functools.partial(_zero_conv_kernel_halo, TH=TH, W=W)
        grid_spec = pltpu.PrefetchScalarGridSpec(
            num_scalar_prefetch=0, grid=(B, NT),
            in_specs=[
                pl.BlockSpec((1, Cin, TH * W), lambda b, t: (b, 0, t)),
                pl.BlockSpec((1, Cin, 8, W),
                             lambda b, t: (b, 0, jnp.maximum(t * NB8 - 1, 0), 0)),
                pl.BlockSpec((1, Cin, 8, W),
                             lambda b, t: (b, 0, jnp.minimum((t + 1) * NB8,
                                                             H // 8 - 1), 0)),
                _single_buffered_spec((9, Cout, Cin), lambda b, t: (0, 0, 0)),
                _single_buffered_spec((Cout, 1), lambda b, t: (0, 0))],
            out_specs=pl.BlockSpec((1, Cout, TH * W), lambda b, t: (b, 0, t)))
        out_flat = pl.pallas_call(
            kernel,
            out_shape=jax.ShapeDtypeStruct((B, Cout, L), jnp.float32),
            grid_spec=grid_spec,
            compiler_params=cparams,
            cost_estimate=cost,
        )(x_flat, x, x, w2g, bg)

    return out_flat.reshape(B, Cout, H, W)


def zero_conv2d_ref(x_nchw, weight, bias, scale):
    """Pure-JAX reference mirroring the PyTorch forward."""
    x_pad = jnp.pad(x_nchw, ((0, 0), (0, 0), (1, 1), (1, 1)), constant_values=1.0)
    y = lax.conv_general_dilated(
        x_pad, weight, window_strides=(1, 1), padding="VALID",
        dimension_numbers=("NCHW", "OIHW", "NCHW"))
    y = y + bias.reshape(1, -1, 1, 1)
    return y * jnp.exp(scale.reshape(1, -1, 1, 1) * 3.0)


if __name__ == "__main__":
    B, Cin, H, W = 2, 4, 16, 16
    Cout = 8

    key = jax.random.PRNGKey(0)
    kx, kw, kb, ks = jax.random.split(key, 4)

    x = jax.random.normal(kx, (B, Cin, H, W), dtype=jnp.float32)
    # NOTE: the original module zero-initializes weight/bias/scale (so its
    # fresh-init output is all zeros). Use small nonzero values to actually
    # exercise the conv + exp-scale compute path.
    weight = 0.1 * jax.random.normal(kw, (Cout, Cin, 3, 3), dtype=jnp.float32)
    bias = 0.1 * jax.random.normal(kb, (Cout,), dtype=jnp.float32)
    scale = 0.1 * jax.random.normal(ks, (Cout,), dtype=jnp.float32)

    ref = jax.block_until_ready(zero_conv2d_ref(x, weight, bias, scale))

    # Single-tile (no-halo) path.
    out = jax.block_until_ready(jax.jit(zero_conv2d)(x, weight, bias, scale))
    assert out.shape == (B, Cout, H, W)
    assert jnp.allclose(out, ref, atol=1e-4, rtol=1e-4), float(
        jnp.max(jnp.abs(out - ref)))

    # Row-tiled (halo) path: force TH=8 -> NT=2.
    out_tiled = jax.block_until_ready(
        jax.jit(functools.partial(zero_conv2d, max_tile_rows=8))(
            x, weight, bias, scale))
    assert jnp.allclose(out_tiled, ref, atol=1e-4, rtol=1e-4), float(
        jnp.max(jnp.abs(out_tiled - ref)))

    # Sanity: with the module's true zero-init, output must be exactly zero.
    zeros_out = jax.block_until_ready(
        zero_conv2d(x, jnp.zeros_like(weight), jnp.zeros_like(bias),
                    jnp.zeros_like(scale)))
    assert jnp.all(zeros_out == 0.0)

    print("KERNEL_OK")
</pallas_src>

<mosaic_0001>
module attributes {stable_mosaic.version = 11 : i64} {
  func.func @_zero_conv_kernel_nohalo(%arg0: i32, %arg1: memref<1x4x256xf32, #tpu.memory_space<vmem>>, %arg2: memref<9x8x4xf32, #tpu.memory_space<vmem>>, %arg3: memref<8x1xf32, #tpu.memory_space<vmem>>, %arg4: memref<1x8x256xf32, #tpu.memory_space<vmem>>) attributes {dimension_semantics = [#tpu.dimension_semantics<parallel>], iteration_bounds = array<i64: 2>, scalar_prefetch = 0 : i64, scratch_operands = 0 : i64, tpu.core_type = #tpu.core_type<tc>, window_params = [{transform_indices = @transform_0, window_bounds = array<i64: 1, 4, 256>}, {pipeline_mode = #tpu.pipeline_mode<synchronous>, transform_indices = @transform_1, window_bounds = array<i64: 9, 8, 4>}, {pipeline_mode = #tpu.pipeline_mode<synchronous>, transform_indices = @transform_2, window_bounds = array<i64: 8, 1>}, {transform_indices = @transform_3, window_bounds = array<i64: 1, 8, 256>}]} {
    %cst = arith.constant 1.000000e+00 : f32
    %0 = vector.broadcast %cst : f32 to vector<4x17xf32>
    %c0 = arith.constant 0 : index
    %c0_0 = arith.constant 0 : index
    %c0_1 = arith.constant 0 : index
    %1 = vector.load %arg1[%c0, %c0_0, %c0_1] : memref<1x4x256xf32, #tpu.memory_space<vmem>>, vector<1x4x256xf32>
    %2 = vector.shape_cast %1 : vector<1x4x256xf32> to vector<4x256xf32>
    %3 = tpu.concatenate %0, %2, %0 in 1 : vector<4x17xf32>, vector<4x256xf32>, vector<4x17xf32> -> vector<4x290xf32>
    %4 = tpu.iota {dimensions = array<i32: 1>} : vector<1x256xi32>
    %c16_i32 = arith.constant 16 : i32
    %c0_i32 = arith.constant 0 : i32
    %5 = arith.cmpi eq, %c16_i32, %c0_i32 : i32
    %c1_i32 = arith.constant 1 : i32
    %6 = arith.select %5, %c1_i32, %c16_i32 : i32
    %7 = vector.broadcast %6 : i32 to vector<1x256xi32>
    %8 = arith.remsi %4, %7 : vector<1x256xi32>
    %c0_i32_2 = arith.constant 0 : i32
    %9 = vector.broadcast %c0_i32_2 : i32 to vector<1x256xi32>
    %10 = arith.cmpi ne, %8, %9 : vector<1x256xi32>
    %c0_i32_3 = arith.constant 0 : i32
    %11 = vector.broadcast %c0_i32_3 : i32 to vector<1x256xi32>
    %12 = arith.cmpi slt, %8, %11 : vector<1x256xi32>
    %c0_i32_4 = arith.constant 0 : i32
    %13 = arith.cmpi slt, %6, %c0_i32_4 : i32
    %14 = vector.broadcast %13 : i1 to vector<1x256xi1>
    %15 = vector.broadcast %14 : vector<1x256xi1> to vector<1x256xi1>
    %16 = arith.xori %12, %15 : vector<1x256xi1>
    %17 = arith.andi %16, %10 : vector<1x256xi1>
    %18 = vector.broadcast %6 : i32 to vector<1x256xi32>
    %19 = arith.addi %8, %18 : vector<1x256xi32>
    %20 = arith.select %17, %19, %8 : vector<1x256xi1>, vector<1x256xi32>
    %c0_i32_5 = arith.constant 0 : i32
    %21 = vector.broadcast %c0_i32_5 : i32 to vector<1x256xi32>
    %22 = arith.cmpi eq, %20, %21 : vector<1x256xi32>
    %c15_i32 = arith.constant 15 : i32
    %23 = vector.broadcast %c15_i32 : i32 to vector<1x256xi32>
    %24 = arith.cmpi eq, %20, %23 : vector<1x256xi32>
    %c0_6 = arith.constant 0 : index
    %c0_7 = arith.constant 0 : index
    %c0_8 = arith.constant 0 : index
    %25 = vector.load %arg2[%c0_6, %c0_7, %c0_8] : memref<9x8x4xf32, #tpu.memory_space<vmem>>, vector<9x8x4xf32>
    %26 = vector.extract_strided_slice %3 {offsets = [0, 0], sizes = [4, 256], strides = [1, 1]} : vector<4x290xf32> to vector<4x256xf32>
    %cst_9 = arith.constant 1.000000e+00 : f32
    %27 = vector.shape_cast %22 : vector<1x256xi1> to vector<1x256xi1>
    %28 = vector.broadcast %27 : vector<1x256xi1> to vector<4x256xi1>
    %29 = vector.broadcast %cst_9 : f32 to vector<4x256xf32>
    %30 = arith.select %28, %29, %26 : vector<4x256xi1>, vector<4x256xf32>
    %31 = vector.extract_strided_slice %25 {offsets = [0, 0, 0], sizes = [1, 8, 4], strides = [1, 1, 1]} : vector<9x8x4xf32> to vector<1x8x4xf32>
    %32 = vector.shape_cast %31 : vector<1x8x4xf32> to vector<8x4xf32>
    %cst_10 = arith.constant dense<0.000000e+00> : vector<8x256xf32>
    %33 = tpu.matmul %32, %30, %cst_10 {dimension_numbers = #tpu.dot_dimension_numbers<[1], [0], [0], [1], [0, 0, 1, 1], [], []>} : vector<8x4xf32>, vector<4x256xf32>, vector<8x256xf32> -> vector<8x256xf32>
    %34 = vector.extract_strided_slice %3 {offsets = [0, 1], sizes = [4, 256], strides = [1, 1]} : vector<4x290xf32> to vector<4x256xf32>
    %35 = vector.extract_strided_slice %25 {offsets = [1, 0, 0], sizes = [1, 8, 4], strides = [1, 1, 1]} : vector<9x8x4xf32> to vector<1x8x4xf32>
    %36 = vector.shape_cast %35 : vector<1x8x4xf32> to vector<8x4xf32>
    %cst_11 = arith.constant dense<0.000000e+00> : vector<8x256xf32>
    %37 = tpu.matmul %36, %34, %cst_11 {dimension_numbers = #tpu.dot_dimension_numbers<[1], [0], [0], [1], [0, 0, 1, 1], [], []>} : vector<8x4xf32>, vector<4x256xf32>, vector<8x256xf32> -> vector<8x256xf32>
    %38 = arith.addf %33, %37 : vector<8x256xf32>
    %39 = vector.extract_strided_slice %3 {offsets = [0, 2], sizes = [4, 256], strides = [1, 1]} : vector<4x290xf32> to vector<4x256xf32>
    %cst_12 = arith.constant 1.000000e+00 : f32
    %40 = vector.shape_cast %24 : vector<1x256xi1> to vector<1x256xi1>
    %41 = vector.broadcast %40 : vector<1x256xi1> to vector<4x256xi1>
    %42 = vector.broadcast %cst_12 : f32 to vector<4x256xf32>
    %43 = arith.select %41, %42, %39 : vector<4x256xi1>, vector<4x256xf32>
    %44 = vector.extract_strided_slice %25 {offsets = [2, 0, 0], sizes = [1, 8, 4], strides = [1, 1, 1]} : vector<9x8x4xf32> to vector<1x8x4xf32>
    %45 = vector.shape_cast %44 : vector<1x8x4xf32> to vector<8x4xf32>
    %cst_13 = arith.constant dense<0.000000e+00> : vector<8x256xf32>
    %46 = tpu.matmul %45, %43, %cst_13 {dimension_numbers = #tpu.dot_dimension_numbers<[1], [0], [0], [1], [0, 0, 1, 1], [], []>} : vector<8x4xf32>, vector<4x256xf32>, vector<8x256xf32> -> vector<8x256xf32>
    %47 = arith.addf %38, %46 : vector<8x256xf32>
    %48 = vector.extract_strided_slice %3 {offsets = [0, 16], sizes = [4, 256], strides = [1, 1]} : vector<4x290xf32> to vector<4x256xf32>
    %cst_14 = arith.constant 1.000000e+00 : f32
    %49 = vector.shape_cast %22 : vector<1x256xi1> to vector<1x256xi1>
    %50 = vector.broadcast %49 : vector<1x256xi1> to vector<4x256xi1>
    %51 = vector.broadcast %cst_14 : f32 to vector<4x256xf32>
    %52 = arith.select %50, %51, %48 : vector<4x256xi1>, vector<4x256xf32>
    %53 = vector.extract_strided_slice %25 {offsets = [3, 0, 0], sizes = [1, 8, 4], strides = [1, 1, 1]} : vector<9x8x4xf32> to vector<1x8x4xf32>
    %54 = vector.shape_cast %53 : vector<1x8x4xf32> to vector<8x4xf32>
    %cst_15 = arith.constant dense<0.000000e+00> : vector<8x256xf32>
    %55 = tpu.matmul %54, %52, %cst_15 {dimension_numbers = #tpu.dot_dimension_numbers<[1], [0], [0], [1], [0, 0, 1, 1], [], []>} : vector<8x4xf32>, vector<4x256xf32>, vector<8x256xf32> -> vector<8x256xf32>
    %56 = arith.addf %47, %55 : vector<8x256xf32>
    %57 = vector.extract_strided_slice %3 {offsets = [0, 17], sizes = [4, 256], strides = [1, 1]} : vector<4x290xf32> to vector<4x256xf32>
    %58 = vector.extract_strided_slice %25 {offsets = [4, 0, 0], sizes = [1, 8, 4], strides = [1, 1, 1]} : vector<9x8x4xf32> to vector<1x8x4xf32>
    %59 = vector.shape_cast %58 : vector<1x8x4xf32> to vector<8x4xf32>
    %cst_16 = arith.constant dense<0.000000e+00> : vector<8x256xf32>
    %60 = tpu.matmul %59, %57, %cst_16 {dimension_numbers = #tpu.dot_dimension_numbers<[1], [0], [0], [1], [0, 0, 1, 1], [], []>} : vector<8x4xf32>, vector<4x256xf32>, vector<8x256xf32> -> vector<8x256xf32>
    %61 = arith.addf %56, %60 : vector<8x256xf32>
    %62 = vector.extract_strided_slice %3 {offsets = [0, 18], sizes = [4, 256], strides = [1, 1]} : vector<4x290xf32> to vector<4x256xf32>
    %cst_17 = arith.constant 1.000000e+00 : f32
    %63 = vector.shape_cast %24 : vector<1x256xi1> to vector<1x256xi1>
    %64 = vector.broadcast %63 : vector<1x256xi1> to vector<4x256xi1>
    %65 = vector.broadcast %cst_17 : f32 to vector<4x256xf32>
    %66 = arith.select %64, %65, %62 : vector<4x256xi1>, vector<4x256xf32>
    %67 = vector.extract_strided_slice %25 {offsets = [5, 0, 0], sizes = [1, 8, 4], strides = [1, 1, 1]} : vector<9x8x4xf32> to vector<1x8x4xf32>
    %68 = vector.shape_cast %67 : vector<1x8x4xf32> to vector<8x4xf32>
    %cst_18 = arith.constant dense<0.000000e+00> : vector<8x256xf32>
    %69 = tpu.matmul %68, %66, %cst_18 {dimension_numbers = #tpu.dot_dimension_numbers<[1], [0], [0], [1], [0, 0, 1, 1], [], []>} : vector<8x4xf32>, vector<4x256xf32>, vector<8x256xf32> -> vector<8x256xf32>
    %70 = arith.addf %61, %69 : vector<8x256xf32>
    %71 = vector.extract_strided_slice %3 {offsets = [0, 32], sizes = [4, 256], strides = [1, 1]} : vector<4x290xf32> to vector<4x256xf32>
    %cst_19 = arith.constant 1.000000e+00 : f32
    %72 = vector.shape_cast %22 : vector<1x256xi1> to vector<1x256xi1>
    %73 = vector.broadcast %72 : vector<1x256xi1> to vector<4x256xi1>
    %74 = vector.broadcast %cst_19 : f32 to vector<4x256xf32>
    %75 = arith.select %73, %74, %71 : vector<4x256xi1>, vector<4x256xf32>
    %76 = vector.extract_strided_slice %25 {offsets = [6, 0, 0], sizes = [1, 8, 4], strides = [1, 1, 1]} : vector<9x8x4xf32> to vector<1x8x4xf32>
    %77 = vector.shape_cast %76 : vector<1x8x4xf32> to vector<8x4xf32>
    %cst_20 = arith.constant dense<0.000000e+00> : vector<8x256xf32>
    %78 = tpu.matmul %77, %75, %cst_20 {dimension_numbers = #tpu.dot_dimension_numbers<[1], [0], [0], [1], [0, 0, 1, 1], [], []>} : vector<8x4xf32>, vector<4x256xf32>, vector<8x256xf32> -> vector<8x256xf32>
    %79 = arith.addf %70, %78 : vector<8x256xf32>
    %80 = vector.extract_strided_slice %3 {offsets = [0, 33], sizes = [4, 256], strides = [1, 1]} : vector<4x290xf32> to vector<4x256xf32>
    %81 = vector.extract_strided_slice %25 {offsets = [7, 0, 0], sizes = [1, 8, 4], strides = [1, 1, 1]} : vector<9x8x4xf32> to vector<1x8x4xf32>
    %82 = vector.shape_cast %81 : vector<1x8x4xf32> to vector<8x4xf32>
    %cst_21 = arith.constant dense<0.000000e+00> : vector<8x256xf32>
    %83 = tpu.matmul %82, %80, %cst_21 {dimension_numbers = #tpu.dot_dimension_numbers<[1], [0], [0], [1], [0, 0, 1, 1], [], []>} : vector<8x4xf32>, vector<4x256xf32>, vector<8x256xf32> -> vector<8x256xf32>
    %84 = arith.addf %79, %83 : vector<8x256xf32>
    %85 = vector.extract_strided_slice %3 {offsets = [0, 34], sizes = [4, 256], strides = [1, 1]} : vector<4x290xf32> to vector<4x256xf32>
    %cst_22 = arith.constant 1.000000e+00 : f32
    %86 = vector.shape_cast %24 : vector<1x256xi1> to vector<1x256xi1>
    %87 = vector.broadcast %86 : vector<1x256xi1> to vector<4x256xi1>
    %88 = vector.broadcast %cst_22 : f32 to vector<4x256xf32>
    %89 = arith.select %87, %88, %85 : vector<4x256xi1>, vector<4x256xf32>
    %90 = vector.extract_strided_slice %25 {offsets = [8, 0, 0], sizes = [1, 8, 4], strides = [1, 1, 1]} : vector<9x8x4xf32> to vector<1x8x4xf32>
    %91 = vector.shape_cast %90 : vector<1x8x4xf32> to vector<8x4xf32>
    %cst_23 = arith.constant dense<0.000000e+00> : vector<8x256xf32>
    %92 = tpu.matmul %91, %89, %cst_23 {dimension_numbers = #tpu.dot_dimension_numbers<[1], [0], [0], [1], [0, 0, 1, 1], [], []>} : vector<8x4xf32>, vector<4x256xf32>, vector<8x256xf32> -> vector<8x256xf32>
    %93 = arith.addf %84, %92 : vector<8x256xf32>
    %c0_24 = arith.constant 0 : index
    %c0_25 = arith.constant 0 : index
    %94 = vector.load %arg3[%c0_24, %c0_25] : memref<8x1xf32, #tpu.memory_space<vmem>>, vector<8x1xf32>
    %95 = vector.broadcast %94 : vector<8x1xf32> to vector<8x256xf32>
    %96 = arith.addf %93, %95 : vector<8x256xf32>
    %c0_26 = arith.constant 0 : index
    %c0_27 = arith.constant 0 : index
    %c0_28 = arith.constant 0 : index
    %97 = vector.load %arg4[%c0_26, %c0_27, %c0_28] : memref<1x8x256xf32, #tpu.memory_space<vmem>>, vector<1x8x256xf32>
    %98 = vector.shape_cast %97 : vector<1x8x256xf32> to vector<8x256xf32>
    %99 = vector.shape_cast %96 : vector<8x256xf32> to vector<1x8x256xf32>
    tpu.vector_store %arg4[%c0_26, %c0_27, %c0_28], %99 {strides = array<i32>} : memref<1x8x256xf32, #tpu.memory_space<vmem>>, vector<1x8x256xf32>,
    return
  }
  func.func @transform_0(%arg0: i32) -> (i32, i32, i32) {
    %c0_i32 = arith.constant 0 : i32
    %c0_i32_0 = arith.constant 0 : i32
    %c0_i32_1 = arith.constant 0 : i32
    return %arg0, %c0_i32, %c0_i32_0 : i32, i32, i32
  }
  func.func @transform_1(%arg0: i32) -> (i32, i32, i32) {
    %c0_i32 = arith.constant 0 : i32
    %c0_i32_0 = arith.constant 0 : i32
    %c0_i32_1 = arith.constant 0 : i32
    %c0_i32_2 = arith.constant 0 : i32
    return %c0_i32, %c0_i32_0, %c0_i32_1 : i32, i32, i32
  }
  func.func @transform_2(%arg0: i32) -> (i32, i32) {
    %c0_i32 = arith.constant 0 : i32
    %c0_i32_0 = arith.constant 0 : i32
    %c0_i32_1 = arith.constant 0 : i32
    return %c0_i32, %c0_i32_0 : i32, i32
  }
  func.func @transform_3(%arg0: i32) -> (i32, i32, i32) {
    %c0_i32 = arith.constant 0 : i32
    %c0_i32_0 = arith.constant 0 : i32
    %c0_i32_1 = arith.constant 0 : i32
    return %arg0, %c0_i32, %c0_i32_0 : i32, i32, i32
  }
}

</mosaic_0001>

<bundles_post_ra>
// kernel: zero_conv2d.1
= control target key start
LH: loop header
LB: loop body
LE: loop exit
PB: predicated region body
PF: predicated region fallthrough
CT: control target
= control target key end

     0   :  { %s1240_s12 = smov 0   ;;  %s1395_s0 = inlined_call_operand.vmem [shape: f32[2,4,256], index: 0, kind: input, shape index: {}]   ;;  %s1396_s1 = inlined_call_operand.vmem [shape: f32[9,8,4], index: 1, kind: input, shape index: {}]   ;;  %s1397_s2 = inlined_call_operand.vmem [shape: f32[8,1], index: 2, kind: input, shape index: {}]   ;;  %s1398_s3 = inlined_call_operand.vmem [shape: f32[2,8,256], index: 3, kind: output, shape index: {}]  }
   0x1 LB: > { %s1124_s13 = sadd.s32 4294967295, %s1207_s12   ;;  %p1128_p0 = scmp.ge.s32.totalorder %s1207_s12, 1  ;;  %s1207_s12 = sphi %s1240_s12, %s13_s12  }
   0x2   : > { %p137_p1 = scmp.lt.s32.totalorder %s1207_s12, 3 }
   0x4   : > { %p138_p2 = pnand %p1128_p0, %p137_p1 }
   0x5   : > { %p161_p3 = scmp.lt.s32.totalorder (!%p138_p2), %s1124_s13, 1  ;;  %s1209_s18 = smov (!%p138_p2), 17   ;;  %vm178_vm0 = vcmask (!%p138_p2), 138240   ;;  %v1214_v4 = vmov (!%p138_p2), 0.0   ;;  %v1219_v8 = vmov (!%p138_p2), 0   ;;  %v1059_v9 = vld [vmem:[%s1397_s2] sm:$0xff] (!%p138_p2)  ;;  %v185_v14 = vlaneseq (!%p138_p2) }
   0x6   : > { %141 = sbr.rel (%p138_p2) target bundleno = 518 (0x206), region = 32  ;;  %s1210_s19 = smov (!%p138_p2), 110   ;;  %676 = vmatprep.mubr.f32.mxu0 (!%p138_p2), %v1214_v4  ;;  %315 = vmatprep.mubr.f32.mxu1 (!%p138_p2), %v1214_v4  ;;  %vm246_vm1 = vcmask (!%p138_p2), 1043456   ;;  %vm602_vm2 = vcmask (!%p138_p2), 908288   ;;  %v220_v26 = vld [vmem:[%s1396_s1 + $0x20] sm:$0xff] (!%p138_p2)  ;;  %vm242_vm3 = vcmask (!%p138_p2), 31744  }
   0x7   : > { %s1211_s20 = smov (!%p138_p2), 111   ;;  %s1212_s21 = smov (!%p138_p2), 96   ;;  %1199 = vset.pattern.permute.xlu0 (!%p138_p2), %v1219_v8  ;;  %v186_v17 = vand.u32 (!%p138_p2), 127, %v185_v14  ;;  %vm691_vm4 = vcmask (!%p138_p2), 900096   ;;  %vm239_vm7 = vcmask (!%p138_p2), 1039360   ;;  %v217_v42 = vld [vmem:[%s1396_s1 + $0x8] sm:$0xff] (!%p138_p2) }
   0x8   : > { %s1213_s22 = smov (!%p138_p2), 127   ;;  %s1215_s23 = smov (!%p138_p2), 95   ;;  %vm786_vm10 = vcmask (!%p138_p2), 785408   ;;  %v221_v43 = vld [vmem:[%s1396_s1 + $0x28] sm:$0xff] (!%p138_p2)  ;;  %vm412_vm11 = vcmask (!%p138_p2), 1031168   ;;  %v216_v56 = vld [vmem:[%s1396_s1] sm:$0xff] (!%p138_p2) }
   0x9   : > { %s1216_s24 = smov (!%p138_p2), 126   ;;  %s1217_s25 = smov (!%p138_p2), 112   ;;  %v187_v20 = vadd.s32 (!%p138_p2), 128, %v186_v17  ;;  %v192_v24 = vand.u32 (!%p138_p2), 15, %v186_v17  ;;  %vm881_vm12 = vcmask (!%p138_p2), 777216   ;;  %v222_v58 = vld [vmem:[%s1396_s1 + $0x30] sm:$0xff] (!%p138_p2) }
   0xa   : > { %s1218_s26 = smov (!%p138_p2), 94   ;;  %vm507_vm13 = vcmask (!%p138_p2), 916480   ;;  %vm970_vm14 = vcmask (!%p138_p2), 769024   ;;  %v223_v8 = vld [vmem:[%s1396_s1 + $0x38] sm:$0xff] (!%p138_p2) }
   0xb   : > { %v199_v25 = vand.u32 (!%p138_p2), 15, %v187_v20  ;;  %vm1289_vm5 = vcmp.eq.s32.totalorder (!%p138_p2), %v192_v24, 15  ;;  %vm1309_vm9 = vcmp.eq.s32.totalorder (!%p138_p2), %v192_v24, 0  ;;  %v219_v14 = vld [vmem:[%s1396_s1 + $0x18] sm:$0xff] (!%p138_p2) }
   0xd   : > { %s1408_s13 = smov (!%p161_p3, %s1124_s13), 1  ;;  %vm1293_vm6 = vcmp.eq.s32.totalorder %v199_v25, 15  ;;  %vm1305_vm8 = vcmp.eq.s32.totalorder %v199_v25, 0 }
   0xe   : > { %s1162_s14 = sshll.u32 %s1408_s13, 3 }
   0xf   : > { %s165_s17 = scalar_lea.vmem %s1395_s0, %s1162_s14 }
  0x10   : > { %v171_v0 = vld [vmem:[%s165_s17] sm:$0xff] }
  0x11   : > { %174 = vrot.lane.b32.xlu0 %v171_v0, %s1209_s18  ;;  %v173_v1 = vcombine.high %v171_v0, %v171_v0 }
  0x15   : > { %176 = vrot.lane.b32.xlu0 %v173_v1, %s1209_s18 }
  0x83   : > { %v175_v2 = vpop.permute.xlu0 %174 }
  0x84   : > { %v1255_v3 = vsel %vm178_vm0, 1.0, %v175_v2 }
  0x85   : > { %685 = vrot.lane.b32.xlu1 %v1255_v3, %s1210_s19  ;;  %596 = vrot.lane.b32.xlu0 %v1255_v3, %s1211_s20  ;;  %v229_v47 = vsel %vm1309_vm9, 1.0, %v1255_v3 }
  0x87   : > { %v177_v5 = vpop.permute.xlu0 %176 }
  0x88   : > { %v184_v6 = vsel %vm178_vm0, %v177_v5, 1.0  ;;  %v1267_v7 = vsel %vm178_vm0, %v175_v2, %v177_v5  ;;  %v218_v5 = vld [vmem:[%s1396_s1 + $0x10] sm:$0xff] }
  0x89   : > { %780 = vrot.lane.b32.xlu1 %v1255_v3, %s1212_s21  ;;  %233 = vrot.lane.b32.xlu0 %v1255_v3, %s1213_s22  ;;  %v230_v44 = vsel %vm1305_vm8, 1.0, %v1267_v7 }
  0x8d   : > { %875 = vrot.lane.b32.xlu1 %v1255_v3, %s1215_s23  ;;  %406 = vrot.lane.b32.xlu0 %v1255_v3, %s1216_s24 }
  0x91   : > { %689 = vrot.lane.b32.xlu0 %v184_v6, %s1210_s19  ;;  %598 = vrot.lane.b32.xlu1 %v1267_v7, %s1211_s20 }
  0x95   : > { %237 = vrot.lane.b32.xlu0 %v184_v6, %s1213_s22  ;;  %600 = vrot.lane.b32.xlu1 %v184_v6, %s1211_s20 }
  0x99   : > { %784 = vrot.lane.b32.xlu0 %v184_v6, %s1212_s21  ;;  %687 = vrot.lane.b32.xlu1 %v1267_v7, %s1210_s19 }
  0x9d   : > { %408 = vrot.lane.b32.xlu0 %v1267_v7, %s1216_s24  ;;  %235 = vrot.lane.b32.xlu1 %v1267_v7, %s1213_s22  ;;  %s1163_s22 = sshll.u32 %s1408_s13, 4 }
  0xa1   : > { %879 = vrot.lane.b32.xlu0 %v184_v6, %s1215_s23  ;;  %782 = vrot.lane.b32.xlu1 %v1267_v7, %s1212_s21 }
  0xa5   : > { %503 = vrot.lane.b32.xlu0 %v1267_v7, %s1217_s25  ;;  %410 = vrot.lane.b32.xlu1 %v184_v6, %s1216_s24 }
  0xa9   : > { %966 = vrot.lane.b32.xlu0 %v1267_v7, %s1218_s26  ;;  %877 = vrot.lane.b32.xlu1 %v1267_v7, %s1215_s23 }
  0xad   : > { %501 = vrot.lane.b32.xlu0 %v1255_v3, %s1217_s25  ;;  %505 = vrot.lane.b32.xlu1 %v184_v6, %s1217_s25  ;;  %s170_s25 = scalar_lea.vmem %s1398_s3, %s1163_s22 }
  0xb1   : > { %968 = vrot.lane.b32.xlu1 %v184_v6, %s1218_s26  ;;  %1062 = vperm.xlu0 %1199, %v1059_v9  }
  0xb5   : > { %964 = vrot.lane.b32.xlu1 %v1255_v3, %s1218_s26 }
  0xf7   : > { %v686_v10 = vpop.permute.xlu1 %685  ;;  %v597_v11 = vpop.permute.xlu0 %596 }
  0xfb   : > { %v781_v12 = vpop.permute.xlu1 %780  ;;  %v234_v13 = vpop.permute.xlu0 %233 }
  0xff   : > { %v1282_v15 = vpop.permute.xlu1 %875  ;;  %v407_v16 = vpop.permute.xlu0 %406 }
 0x103   : > { %v599_v18 = vpop.permute.xlu1 %598  ;;  %v690_v19 = vpop.permute.xlu0 %689 }
 0x104   : > { %v603_v27 = vsel %vm602_vm2, %v597_v11, %v599_v18 }
 0x107   : > { %v601_v21 = vpop.permute.xlu1 %600  ;;  %v238_v22 = vpop.permute.xlu0 %237 }
 0x108   : > { %v604_v23 = vsel %vm602_vm2, %v599_v18, %v601_v21 }
 0x109   : > { %1145 = vmatprep.subr.msk.mxu0 %vm246_vm1, %v604_v23 }
 0x10a   : > { %1146 = vmatpush1.msk.msra.mxu0 %vm246_vm1, %v603_v27 }
 0x10b   : > { %v688_v30 = vpop.permute.xlu1 %687  ;;  %1147 = vmatmul.mubr.msk.f32.vlgmr.msra.gmra.mrb[0].mxu0 %vm242_vm3, %v220_v26  ;;  %v785_v31 = vpop.permute.xlu0 %784 }
 0x10c   : > { %v692_v32 = vsel %vm691_vm4, %v686_v10, %v688_v30  ;;  %v693_v33 = vsel %vm691_vm4, %v688_v30, %v690_v19  ;;  %771 = vmatprep.mubr.f32.mxu0 %v1214_v4 }
 0x10d   : > { %v696_v34 = vsel %vm1289_vm5, 1.0, %v692_v32  ;;  %v697_v35 = vsel %vm1293_vm6, 1.0, %v693_v33 }
 0x10e   : > { %1148 = vmatprep.subr.msk.mxu0 %vm246_vm1, %v697_v35 }
 0x10f   : > { %v236_v36 = vpop.permute.xlu1 %235  ;;  %1149 = vmatpush1.msk.msra.mxu0 %vm246_vm1, %v696_v34  ;;  %v409_v37 = vpop.permute.xlu0 %408 }
 0x110   : > { %v241_v39 = vsel %vm239_vm7, %v236_v36, %v238_v22  ;;  %v240_v40 = vsel %vm239_vm7, %v234_v13, %v236_v36  ;;  %v413_v54 = vsel %vm412_vm11, %v407_v16, %v409_v37  ;;  %v224_v16 = vld [vmem:[%s1396_s1 + $0x40] sm:$0xff] }
 0x111   : > { %1133 = vmatprep.subr.msk.mxu1 %vm246_vm1, %v241_v39  ;;  %v417_v59 = vsel %vm1289_vm5, 1.0, %v413_v54 }
 0x112   : > { %1134 = vmatpush1.msk.msra.mxu1 %vm246_vm1, %v240_v40 }
 0x113   : > { %v783_v45 = vpop.permute.xlu1 %782  ;;  %1135 = vmatmul.mubr.msk.f32.vlgmr.msra.gmra.mrb[0].mxu1 %vm242_vm3, %v217_v42  ;;  %1136 = vmatprep.subr.msk.mxu1 %vm246_vm1, %v230_v44  ;;  %v880_v46 = vpop.permute.xlu0 %879 }
 0x114   : > { %v787_v48 = vsel %vm786_vm10, %v781_v12, %v783_v45  ;;  %v788_v49 = vsel %vm786_vm10, %v783_v45, %v785_v31  ;;  %1150 = vmatmul.mubr.msk.f32.vlgmr.msra.gmra.mrb[0].mxu0 %vm242_vm3, %v221_v43  ;;  %1137 = vmatpush1.msk.msra.mxu1 %vm246_vm1, %v229_v47 }
 0x115   : > { %v791_v50 = vsel %vm1309_vm9, 1.0, %v787_v48  ;;  %v792_v51 = vsel %vm1305_vm8, 1.0, %v788_v49  ;;  %395 = vmatprep.mubr.f32.mxu1 %v1214_v4  ;;  %866 = vmatprep.mubr.f32.mxu0 %v1214_v4 }
 0x116   : > { %1151 = vmatprep.subr.msk.mxu0 %vm246_vm1, %v792_v51 }
 0x117   : > { %v411_v52 = vpop.permute.xlu1 %410  ;;  %1152 = vmatpush1.msk.msra.mxu0 %vm246_vm1, %v791_v50  ;;  %v504_v53 = vpop.permute.xlu0 %503 }
 0x118   : > { %v414_v55 = vsel %vm412_vm11, %v409_v37, %v411_v52 }
 0x119   : > { %v418_v57 = vsel %vm1293_vm6, 1.0, %v414_v55 }
 0x11a   : > { %1139 = vmatprep.subr.msk.mxu1 %vm246_vm1, %v418_v57 }
 0x11b   : > { %v878_v60 = vpop.permute.xlu1 %877  ;;  %1138 = vmatmul.mubr.msk.f32.vlgmr.msra.gmra.mrb[0].mxu1 %vm242_vm3, %v216_v56  ;;  %v967_v61 = vpop.permute.xlu0 %966 }
 0x11c   : > { %v882_v62 = vsel %vm881_vm12, %v1282_v15, %v878_v60  ;;  %v883_v63 = vsel %vm881_vm12, %v878_v60, %v880_v46  ;;  %1140 = vmatpush1.msk.msra.mxu1 %vm246_vm1, %v417_v59  ;;  %1153 = vmatmul.mubr.msk.f32.vlgmr.msra.gmra.mrb[0].mxu0 %vm242_vm3, %v222_v58 }
 0x11d   : > { %1154 = vmatprep.subr.msk.mxu0 %vm246_vm1, %v883_v63  ;;  %492 = vmatprep.mubr.f32.mxu1 %v1214_v4 }
 0x11e   : > { %1155 = vmatpush1.msk.msra.mxu0 %vm246_vm1, %v882_v62  ;;  %955 = vmatprep.mubr.f32.mxu0 %v1214_v4 }
 0x11f   : > { %v506_v0 = vpop.permute.xlu1 %505  ;;  %v502_v1 = vpop.permute.xlu0 %501 }
 0x120   : > { %v509_v2 = vsel %vm507_vm13, %v504_v53, %v506_v0  ;;  %v508_v3 = vsel %vm507_vm13, %v502_v1, %v504_v53 }
 0x121   : > { %v513_v6 = vsel %vm1305_vm8, 1.0, %v509_v2  ;;  %v512_v7 = vsel %vm1309_vm9, 1.0, %v508_v3 }
 0x122   : > { %1142 = vmatprep.subr.msk.mxu1 %vm246_vm1, %v513_v6 }
 0x123   : > { %v969_v9 = vpop.permute.xlu1 %968  ;;  %1141 = vmatmul.mubr.msk.f32.vlgmr.msra.gmra.mrb[0].mxu1 %vm242_vm3, %v218_v5 }
 0x124   : > { %v972_v10 = vsel %vm970_vm14, %v967_v61, %v969_v9  ;;  %1143 = vmatpush1.msk.msra.mxu1 %vm246_vm1, %v512_v7  ;;  %1156 = vmatmul.mubr.msk.f32.vlgmr.msra.gmra.mrb[0].mxu0 %vm242_vm3, %v223_v8 }
 0x125   : > { %v976_v11 = vsel %vm1293_vm6, 1.0, %v972_v10  ;;  %587 = vmatprep.mubr.f32.mxu1 %v1214_v4  ;;  %1050 = vmatprep.mubr.f32.mxu0 %v1214_v4 }
 0x126   : > { %1157 = vmatprep.subr.msk.mxu0 %vm246_vm1, %v976_v11 }
 0x127   : > { %v965_v12 = vpop.permute.xlu1 %964 }
 0x128   : > { %v971_v13 = vsel %vm970_vm14, %v965_v12, %v967_v61 }
 0x129   : > { %v975_v15 = vsel %vm1289_vm5, 1.0, %v971_v13 }
 0x12a   : > { %1158 = vmatpush1.msk.msra.mxu0 %vm246_vm1, %v975_v15 }
 0x12b   : > { %1144 = vmatmul.mubr.msk.f32.vlgmr.msra.gmra.mrb[0].mxu1 %vm242_vm3, %v219_v14 }
 0x12c   : > { %1159 = vmatmul.mubr.msk.f32.vlgmr.msra.gmra.mrb[0].mxu0 %vm242_vm3, %v224_v16 }
 0x130   : > { %v1063_v17 = vpop.permute.xlu0 %1062 }
 0x1fe   : > { %v589_v4 = vpop.f32.mrb[0].mxu1 }
 0x1ff   : > { %v1052_v18 = vpop.f32.mrb[0].mxu0  ;;  %v591_v19 = vpop.f32.mrb[1].mxu1 }
 0x200   : > { %v1164_v20 = vadd.f32 %v1052_v18, %v589_v4  ;;  %v1054_v21 = vpop.f32.mrb[1].mxu0 }
 0x201   : > { %v1165_v22 = vadd.f32 %v1054_v21, %v591_v19 }
 0x202   : > { %v1065_v23 = vadd.f32 %v1164_v20, %v1063_v17 }
 0x203   : > { %v1066_v24 = vadd.f32 %v1165_v22, %v1063_v17 }
 0x204   : > { %1067 = vst [vmem:[%s170_s25] sm:$0xff] %v1065_v23 }
 0x205   : > { %1068 = vst [vmem:[%s170_s25 + $0x8] sm:$0xff] %v1066_v24 }
 0x206 PF: > { %s13_s12 = sadd.s32 1, %s1207_s12  }
 0x207   : > { %p10_p4 = scmp.ge.s32.totalorder %s13_s12, 4  }
 0x209   :  { %12 = sbr.rel (!%p10_p4) target bundleno = 1 (0x1), region = 62 }

</bundles_post_ra>
